<compile_context>
chip_gen: v7x
topology: tpu7x:2x2x1
jax: 0.10.0
libtpu: 0.0.40
codegen_flags: <defaults>
</compile_context>

<pallas_src>
import functools

import jax
import jax.numpy as jnp
from jax.experimental import pallas as pl
from jax.experimental.pallas import tpu as pltpu


def _round_up(x, m):
    return ((x + m - 1) // m) * m


def _mtl_ce_kernel(logits_ref, tgt_ref, out_ref, *, inv_n, total_rows, block_rows):
    # logits_ref: (tm, C) native dtype
    # tgt_ref:    (tm, 1) int32 class indices
    # out_ref:    (1, 128) f32 — this tile's partial loss broadcast across the lane dim
    x = logits_ref[...]                                    # native dtype (no up-front f32 copy)
    tgt = tgt_ref[...]                                     # (tm, 1) int32
    tm, c = x.shape

    # numerically stable log-sum-exp; keep max/subtract in native dtype, cast at exp
    row_max = jnp.max(x, axis=-1, keepdims=True)           # (tm, 1) native
    shifted = x - row_max                                  # (tm, C) native
    lse = jnp.log(jnp.sum(jnp.exp(shifted.astype(jnp.float32)),
                          axis=-1, keepdims=True))         # (tm, 1) f32

    # target-class shifted logit via one-hot mask (VPU-only, no cross-lane gather, no MXU).
    # Exactly one non-zero term per row, so the native-dtype sum is exact.
    col = jax.lax.broadcasted_iota(jnp.int32, (tm, c), 1)  # (tm, C)
    tgt_logit = jnp.sum(jnp.where(col == tgt, shifted, jnp.zeros_like(shifted)),
                        axis=-1, keepdims=True).astype(jnp.float32)   # (tm, 1) f32

    per_sample = lse - tgt_logit                           # (tm, 1) f32

    # mask rows past the true end of the flattened batch (ragged last tile)
    row = pl.program_id(0) * block_rows + jax.lax.broadcasted_iota(jnp.int32, (tm, 1), 0)
    per_sample = jnp.where(row < total_rows, per_sample, 0.0)

    # All tasks share batch size N:  sum_t mean_n CE == (1/N) * sum over all T*N samples.
    partial = jnp.sum(per_sample) * inv_n                  # scalar f32
    out_ref[...] = jnp.full(out_ref.shape, partial, dtype=out_ref.dtype)


def multi_task_loss(logits, targets, *, block_rows=512):
    """logits: (T, N, C) float (any dtype); targets: (T, N) int. Returns scalar total loss."""
    T, N, C = logits.shape
    M = T * N
    logits2d = logits.reshape(M, C)                        # native dtype, no wrapper cast
    targets2d = targets.reshape(M, 1).astype(jnp.int32)

    tm = min(block_rows, _round_up(M, 8))                  # row tile, multiple of 8
    num_tiles = pl.cdiv(M, tm)

    kernel = functools.partial(_mtl_ce_kernel,
                               inv_n=1.0 / N, total_rows=M, block_rows=tm)

    partials = pl.pallas_call(
        kernel,
        grid=(num_tiles,),
        out_shape=jax.ShapeDtypeStruct((num_tiles, 128), jnp.float32),
        in_specs=[
            pl.BlockSpec((tm, C), lambda i: (i, 0)),       # logits row tile
            pl.BlockSpec((tm, 1), lambda i: (i, 0)),       # matching targets
        ],
        out_specs=pl.BlockSpec((1, 128), lambda i: (i, 0)),  # lane-dense partial per tile
        compiler_params=pltpu.CompilerParams(
            dimension_semantics=("parallel",),             # row tiles are independent (v7x 2 TCs)
            vmem_limit_bytes=32 * 1024 * 1024,
        ),
    )(logits2d, targets2d)

    return jnp.sum(partials[:, 0])


def _reference(logits, targets):
    # plain-JAX reference: sum_i mean_n CE(outputs[i], targets[i])
    logp = jax.nn.log_softmax(logits.astype(jnp.float32), axis=-1)        # (T, N, C)
    picked = jnp.take_along_axis(
        logp, targets[..., None].astype(jnp.int32), axis=-1)[..., 0]      # (T, N)
    return jnp.sum(-jnp.mean(picked, axis=-1))


if __name__ == "__main__":
    key = jax.random.PRNGKey(0)

    # --- module-sized test: MultiTaskLoss(num_tasks=3), batch=8, 32 classes per task ---
    num_tasks, N, C = 3, 8, 32
    k_logits, k_tgt, k2_logits, k2_tgt = jax.random.split(key, 4)
    logits = jax.random.normal(k_logits, (num_tasks, N, C), dtype=jnp.float32)
    targets = jax.random.randint(k_tgt, (num_tasks, N), 0, C, dtype=jnp.int32)

    loss = jax.block_until_ready(multi_task_loss(logits, targets))
    ref = jax.block_until_ready(_reference(logits, targets))
    assert jnp.allclose(loss, ref, rtol=1e-5, atol=1e-5), (loss, ref)

    # --- native bf16 path (wrapper no longer upcasts; kernel defers the f32 cast) ---
    logits_bf16 = logits.astype(jnp.bfloat16)
    loss_bf16 = jax.block_until_ready(multi_task_loss(logits_bf16, targets))
    ref_bf16 = jax.block_until_ready(_reference(logits_bf16, targets))
    assert jnp.allclose(loss_bf16, ref_bf16, rtol=2e-2, atol=2e-2), (loss_bf16, ref_bf16)

    # --- multi-tile grid + ragged last tile (M=300 rows, 64-row tiles -> 5 tiles, 44 valid in last) ---
    T2, N2, C2 = 3, 100, 40
    logits2 = jax.random.normal(k2_logits, (T2, N2, C2), dtype=jnp.float32)
    targets2 = jax.random.randint(k2_tgt, (T2, N2), 0, C2, dtype=jnp.int32)
    loss2 = jax.block_until_ready(multi_task_loss(logits2, targets2, block_rows=64))
    ref2 = jax.block_until_ready(_reference(logits2, targets2))
    assert jnp.allclose(loss2, ref2, rtol=1e-5, atol=1e-4), (loss2, ref2)

    print("KERNEL_OK")
</pallas_src>

<mosaic_0001>
module attributes {stable_mosaic.version = 11 : i64} {
  func.func @_mtl_ce_kernel(%arg0: i32, %arg1: memref<24x32xf32, #tpu.memory_space<vmem>>, %arg2: memref<24x1xi32, #tpu.memory_space<vmem>>, %arg3: memref<1x128xf32, #tpu.memory_space<vmem>>) attributes {dimension_semantics = [#tpu.dimension_semantics<parallel>], iteration_bounds = array<i64: 1>, scalar_prefetch = 0 : i64, scratch_operands = 0 : i64, tpu.core_type = #tpu.core_type<tc>, window_params = [{transform_indices = @transform_0, window_bounds = array<i64: 24, 32>}, {transform_indices = @transform_1, window_bounds = array<i64: 24, 1>}, {transform_indices = @transform_2, window_bounds = array<i64: 1, 128>}]} {
    %c0 = arith.constant 0 : index
    %c0_0 = arith.constant 0 : index
    %0 = vector.load %arg1[%c0, %c0_0] : memref<24x32xf32, #tpu.memory_space<vmem>>, vector<24x32xf32>
    %c0_1 = arith.constant 0 : index
    %c0_2 = arith.constant 0 : index
    %1 = vector.load %arg2[%c0_1, %c0_2] : memref<24x1xi32, #tpu.memory_space<vmem>>, vector<24x1xi32>
    %cst = arith.constant dense<0xFF800000> : vector<24xf32>
    %2 = vector.multi_reduction <maximumf>, %0, %cst [1] : vector<24x32xf32> to vector<24xf32>
    %3 = vector.shape_cast %2 : vector<24xf32> to vector<24x1xf32>
    %4 = vector.broadcast %3 : vector<24x1xf32> to vector<24x32xf32>
    %5 = arith.subf %0, %4 : vector<24x32xf32>
    %6 = math.exp %5 : vector<24x32xf32>
    %cst_3 = arith.constant dense<0.000000e+00> : vector<24xf32>
    %7 = vector.multi_reduction <add>, %6, %cst_3 [1] : vector<24x32xf32> to vector<24xf32>
    %8 = vector.shape_cast %7 : vector<24xf32> to vector<24x1xf32>
    %9 = math.log %8 : vector<24x1xf32>
    %10 = tpu.iota {dimensions = array<i32: 1>} : vector<24x32xi32>
    %11 = vector.broadcast %1 : vector<24x1xi32> to vector<24x32xi32>
    %12 = arith.cmpi eq, %10, %11 : vector<24x32xi32>
    %cst_4 = arith.constant 0.000000e+00 : f32
    %13 = vector.broadcast %cst_4 : f32 to vector<24x32xf32>
    %14 = arith.select %12, %5, %13 : vector<24x32xi1>, vector<24x32xf32>
    %cst_5 = arith.constant dense<0.000000e+00> : vector<24xf32>
    %15 = vector.multi_reduction <add>, %14, %cst_5 [1] : vector<24x32xf32> to vector<24xf32>
    %16 = vector.shape_cast %15 : vector<24xf32> to vector<24x1xf32>
    %17 = arith.subf %9, %16 : vector<24x1xf32>
    %c24_i32 = arith.constant 24 : i32
    %18 = arith.muli %arg0, %c24_i32 : i32
    %19 = tpu.iota {dimensions = array<i32: 0>} : vector<24x1xi32>
    %20 = vector.broadcast %18 : i32 to vector<24x1xi32>
    %21 = arith.addi %20, %19 : vector<24x1xi32>
    %c24_i32_6 = arith.constant 24 : i32
    %22 = vector.broadcast %c24_i32_6 : i32 to vector<24x1xi32>
    %23 = arith.cmpi slt, %21, %22 : vector<24x1xi32>
    %cst_7 = arith.constant 0.000000e+00 : f32
    %24 = vector.broadcast %cst_7 : f32 to vector<24x1xf32>
    %25 = arith.select %23, %17, %24 : vector<24x1xi1>, vector<24x1xf32>
    %26 = vector.shape_cast %25 : vector<24x1xf32> to vector<1x24x1xf32>
    %cst_8 = arith.constant dense<0.000000e+00> : vector<1xf32>
    %27 = vector.multi_reduction <add>, %26, %cst_8 [1, 2] : vector<1x24x1xf32> to vector<1xf32>
    %28 = vector.shape_cast %27 : vector<1xf32> to vector<1x1x1xf32>
    %29 = vector.extract %28[0, 0, 0] : f32 from vector<1x1x1xf32>
    %cst_9 = arith.constant 1.250000e-01 : f32
    %30 = arith.mulf %29, %cst_9 : f32
    %31 = vector.broadcast %30 : f32 to vector<1x128xf32>
    %c0_10 = arith.constant 0 : index
    %c0_11 = arith.constant 0 : index
    %32 = vector.load %arg3[%c0_10, %c0_11] : memref<1x128xf32, #tpu.memory_space<vmem>>, vector<1x128xf32>
    tpu.vector_store %arg3[%c0_10, %c0_11], %31 {strides = array<i32>} : memref<1x128xf32, #tpu.memory_space<vmem>>, vector<1x128xf32>,
    return
  }
  func.func @transform_0(%arg0: i32) -> (i32, i32) {
    %c0_i32 = arith.constant 0 : i32
    %c0_i32_0 = arith.constant 0 : i32
    return %arg0, %c0_i32 : i32, i32
  }
  func.func @transform_1(%arg0: i32) -> (i32, i32) {
    %c0_i32 = arith.constant 0 : i32
    %c0_i32_0 = arith.constant 0 : i32
    return %arg0, %c0_i32 : i32, i32
  }
  func.func @transform_2(%arg0: i32) -> (i32, i32) {
    %c0_i32 = arith.constant 0 : i32
    %c0_i32_0 = arith.constant 0 : i32
    return %arg0, %c0_i32 : i32, i32
  }
}

</mosaic_0001>

<bundles_post_ra>
// kernel: tpu_custom_call.1
= control target key start
LH: loop header
LB: loop body
LE: loop exit
PB: predicated region body
PF: predicated region fallthrough
CT: control target
= control target key end

     0   :  { %vm18_vm0 = vcmask 261120   ;;  %v170_v5 = vmov 0   ;;  %s226_s0 = inlined_call_operand.vmem [shape: f32[24,32], index: 0, kind: input, shape index: {}]   ;;  %s227_s1 = inlined_call_operand.vmem [shape: s32[24,1], index: 1, kind: input, shape index: {}]   ;;  %s228_s2 = inlined_call_operand.hbm [shape: f32[1,128], index: 2, kind: output, shape index: {}]  }
   0x1   :  { %v14_v0 = vld [vmem:[%s226_s0 + $0x10] sm:$0xff]  ;;  %v12_v1 = vld [vmem:[%s226_s0] sm:$0xff]  ;;  %v13_v2 = vld [vmem:[%s226_s0 + $0x8] sm:$0xff]  ;;  %132 = vset.pattern.permute.xlu1 %v170_v5  ;;  %133 = vset.pattern.permute.xlu0 %v170_v5 }
   0x2   :  { %v25_v3 = vsel %vm18_vm0, %v14_v0, -inf  ;;  %v19_v4 = vsel %vm18_vm0, %v12_v1, -inf }
   0x3   :  { %26 = vmax.xlane.f32.xlu1 %v25_v3  ;;  %20 = vmax.xlane.f32.xlu0 %v19_v4 }
   0x4   :  { %7 = vsyncpa [#allocation3], 0  ;;  %v22_v6 = vsel %vm18_vm0, %v13_v2, -inf  ;;  %v15_v7 = vld [vmem:[%s227_s1] sm:$0xff]  ;;  %v17_v8 = vld [vmem:[%s227_s1 + $0x10] sm:$0xff]  ;;  %v52_v19 = vlaneseq  ;;  %vm96_vm4 = vcmask 7168  }
   0x5   :  { %v16_v9 = vld [vmem:[%s227_s1 + $0x8] sm:$0xff]  ;;  %s171_s1 = smov [#allocation2]  }
   0x6   :  { %v53_v21 = vand.u32 127, %v52_v19  ;;  %s120_s20 = sshll.u32 %s171_s1, 4  ;;  %s121_s20 = int_to_ptr.vmem [resolvable:$true] %s120_s20 }
   0x7   :  { %23 = vmax.xlane.f32.xlu0 %v22_v6  ;;  %s146_s23 = scalar_lea.vmem %s121_s20, 16  ;;  %s150_s24 = scalar_lea.vmem %s121_s20, 32 }
   0x8   :  { %p147_p0 = scmp.ne.s32.totalorder %s121_s20, %s146_s23  ;;  %p151_p1 = scmp.lt.s32.totalorder %s121_s20, %s121_s20 }
   0x9   :  { %p152_p2 = scmp.lt.s32.totalorder %s150_s24, %s146_s23 }
   0xb   :  { %p153_p3 = por %p152_p2, %p151_p1 }
   0xd   :  { %p154_p4 = pnand %p153_p3, %p147_p0 }
  0x14   :  { %55 = vperm.xlu1 %132, %v15_v7  }
  0x18   :  { %61 = vperm.xlu1 %132, %v17_v8  }
  0x1d   :  { %58 = vperm.xlu0 %133, %v16_v9  }
  0x90   :  { %v27_v10 = vpop.xlane.xlu1 %26  ;;  %v21_v11 = vpop.xlane.xlu0 %20 }
  0x91   :  { %v30_v12 = vsub.f32 %v14_v0, %v27_v10  ;;  %v28_v13 = vsub.f32 %v12_v1, %v21_v11 }
  0x93   :  { %v35_v14 = vmul.f32 1.442695, %v30_v12  ;;  %v31_v15 = vmul.f32 1.442695, %v28_v13 }
  0x94   :  { %v24_v16 = vpop.xlane.xlu0 %23  ;;  %v56_v23 = vpop.permute.xlu1 %55 }
  0x95   :  { %134 = vpow2.f32 %v35_v14  ;;  %v29_v17 = vsub.f32 %v13_v2, %v24_v16  ;;  %vm63_vm1 = vcmp.eq.s32.totalorder %v53_v21, %v56_v23 }
  0x96   :  { %136 = vpow2.f32 %v31_v15  ;;  %v66_v29 = vsel %vm63_vm1, %v28_v13, 0.0 }
  0x97   :  { %v33_v18 = vmul.f32 1.442695, %v29_v17  ;;  %v69_v31 = vsel %vm18_vm0, %v66_v29, 0.0 }
  0x98   :  { %v62_v30 = vpop.permute.xlu1 %61 }
  0x99   :  { %138 = vpow2.f32 %v33_v18  ;;  %vm65_vm3 = vcmp.eq.s32.totalorder %v53_v21, %v62_v30 }
  0x9a   :  { %v68_v34 = vsel %vm65_vm3, %v30_v12, 0.0 }
  0x9b   :  { %v75_v35 = vsel %vm18_vm0, %v68_v34, 0.0 }
  0x9c   :  { %v59_v27 = vpop.permute.xlu0 %58 }
  0x9d   :  { %vm64_vm2 = vcmp.eq.s32.totalorder %v53_v21, %v59_v27 }
  0x9e   :  { %v67_v32 = vsel %vm64_vm2, %v29_v17, 0.0 }
  0x9f   :  { %v135_v20 = vpop.eup %134  ;;  %v72_v33 = vsel %vm18_vm0, %v67_v32, 0.0 }
  0xa0   :  { %v137_v22 = vpop.eup %136  ;;  %v43_v26 = vsel %vm18_vm0, %v135_v20, 0.0 }
  0xa1   :  { %v37_v24 = vsel %vm18_vm0, %v137_v22, 0.0 }
  0xa2   :  { %38 = vadd.xlane.f32.xlu1 %v37_v24 }
  0xa3   :  { %v139_v25 = vpop.eup %138 }
  0xa4   :  { %v40_v28 = vsel %vm18_vm0, %v139_v25, 0.0 }
  0xa5   :  { %41 = vadd.xlane.f32.xlu0 %v40_v28 }
  0xa6   :  { %44 = vadd.xlane.f32.xlu1 %v43_v26 }
  0xaa   :  { %70 = vadd.xlane.f32.xlu1 %v69_v31 }
  0xae   :  { %73 = vadd.xlane.f32.xlu1 %v72_v33 }
  0xb2   :  { %76 = vadd.xlane.f32.xlu1 %v75_v35 }
 0x12f   :  { %v39_v36 = vpop.xlane.xlu1 %38 }
 0x130   :  { %140 = vlog2.f32 %v39_v36 }
 0x132   :  { %v42_v37 = vpop.xlane.xlu0 %41 }
 0x133   :  { %v45_v38 = vpop.xlane.xlu1 %44  ;;  %142 = vlog2.f32 %v42_v37 }
 0x134   :  { %144 = vlog2.f32 %v45_v38 }
 0x137   :  { %v71_v39 = vpop.xlane.xlu1 %70 }
 0x13a   :  { %v141_v40 = vpop.eup %140 }
 0x13b   :  { %v47_v41 = vmul.f32 0.6931472, %v141_v40  ;;  %v74_v42 = vpop.xlane.xlu1 %73 }
 0x13d   :  { %v143_v43 = vpop.eup %142  ;;  %v78_v45 = vsub.f32 %v47_v41, %v71_v39 }
 0x13e   :  { %v145_v44 = vpop.eup %144  ;;  %v49_v46 = vmul.f32 0.6931472, %v143_v43 }
 0x13f   :  { %v51_v47 = vmul.f32 0.6931472, %v145_v44  ;;  %v77_v48 = vpop.xlane.xlu1 %76  ;;  %v97_v51 = vsel %vm96_vm4, %v78_v45, 0.0 }
 0x140   :  { %v79_v49 = vsub.f32 %v49_v46, %v74_v42 }
 0x141   :  { %v80_v50 = vsub.f32 %v51_v47, %v77_v48 }
 0x142   :  { %v98_v52 = vsel %vm96_vm4, %v79_v49, 0.0 }
 0x143   :  { %v99_v53 = vadd.f32 %v98_v52, %v97_v51  ;;  %v100_v54 = vsel %vm96_vm4, %v80_v50, 0.0 }
 0x145   :  { %v101_v55 = vadd.f32 %v100_v54, %v99_v53 }
 0x147   :  { %102 = vadd.xlane.f32.xlu1 %v101_v55 }
 0x1d4   :  { %v103_v56 = vpop.xlane.xlu1 %102 }
 0x1d5   :  { %v104_v57 = vrot.slane %v103_v56, 4 }
 0x1d7   :  { %v105_v58 = vadd.f32 %v104_v57, %v103_v56 }
 0x1d9   :  { %v106_v59 = vrot.slane %v105_v58, 2 }
 0x1db   :  { %v107_v60 = vadd.f32 %v106_v59, %v105_v58 }
 0x1dd   :  { %v108_v61 = vrot.slane %v107_v60, 1 }
 0x1df   :  { %v109_v62 = vadd.f32 %v108_v61, %v107_v60 }
 0x1e1   :  { %128 = vpush %v109_v62 }
 0x212   :  { %s129_s21 = spop %128 }
 0x213   :  { %s111_s22 = smul.f32 0.125, %s129_s21 }
 0x215   :  { %v112_v63 = vstv %s111_s22 }
 0x216   :  { %113 = vst [vmem:[#allocation2] sm:$0x1] %v112_v63 }
 0x217   :  { %157 = shalt.err (!%p154_p4)
}
 0x218   :  { %s158_s27 = scalar_lea.hbm %s228_s2, 16 }
 0x219   :  { %p159_p5 = scmp.ne.s32.totalorder %s228_s2, %s158_s27  ;;  %p162_p6 = scmp.lt.u32.totalorder %s158_s27, %s228_s2 }
 0x21b   :  { %p164_p7 = pnand %p162_p6, %p159_p5 }
 0x21d   :  { %167 = shalt.err (!%p164_p7)
}
 0x21e   :  { %123 = dma.vmem_to_hbm [thread:$0]  %s121_s20, 16, %s228_s2, [#allocation3]  }
 0x21f   :  { %168 = dma.done.wait [#allocation3], 16  }
 0x220   :  { %169 = vsyncadd [#allocation3], 4294967280 }
 0x221   :  { %127 = vsyncpa [#allocation3], 1 }

</bundles_post_ra>
